<compile_context>
chip_gen: v7x
topology: tpu7x:2x2x1
jax: 0.10.0
libtpu: 0.0.40
codegen_flags: <defaults>
</compile_context>

<pallas_src>
import functools

import jax
import jax.numpy as jnp
from jax.experimental import pallas as pl
from jax.experimental.pallas import tpu as pltpu


def _temporal_block_kernel(x_ref, w1aug_ref, b1_ref, w2_ref, b2_ref, bd_ref,
                           o_ref, xpad_ref, h1pad_ref, *, dilation, kernel_size):
    """One batch element per grid step; all tiles are channels-major (C, L).

    x_ref     : (1, Cin, L)            bf16 input (NCL, untouched by wrapper)
    w1aug_ref : (2*Cout, K*Cin)        bf16 fused [conv1 ; 1x1 downsample] weight
    b1_ref    : (Cout, 1)              f32 conv1 bias
    w2_ref    : (Cout, K*Cout)         bf16 conv2 weight (im2col layout)
    b2_ref    : (Cout, 1)              f32 conv2 bias
    bd_ref    : (Cout, 1)              f32 downsample bias
    o_ref     : (1, Cout, L)           f32 output (NCL -> lane dim is time)
    xpad_ref  : (Cin, L+pad)  VMEM     causally left-padded input staging
    h1pad_ref : (Cout, L+pad) VMEM     causally left-padded out1 staging
    """
    K = kernel_size
    d = dilation
    Cin, L_pad = xpad_ref.shape
    Cout = o_ref.shape[1]
    L = o_ref.shape[2]
    pad = L_pad - L
    cdt = xpad_ref.dtype

    # ---- causal zero-padding columns: constant -> written once (grid step 0)
    if pad:
        @pl.when(pl.program_id(0) == 0)
        def _():
            xpad_ref[:, :pad] = jnp.zeros((Cin, pad), cdt)
            h1pad_ref[:, :pad] = jnp.zeros((Cout, pad), cdt)

    # ---- stage causally padded input in VMEM (no wrapper pad, no concat copy)
    xpad_ref[:, pad:] = x_ref[0]

    # ---- conv1 + folded 1x1 downsample: ONE im2col matmul on the MXU --------
    # xcol rows = K dilated causal slices stacked along the channel axis.
    xcol = jnp.concatenate(
        [xpad_ref[:, k * d: k * d + L] for k in range(K)], axis=0)     # (K*Cin, L)
    y1 = jnp.dot(w1aug_ref[...], xcol,
                 preferred_element_type=jnp.float32)                   # (2*Cout, L)
    out1 = jnp.maximum(y1[:Cout, :] + b1_ref[...], 0.0)                # (Cout, L)
    res = y1[Cout:, :] + bd_ref[...]                                   # (Cout, L)
    # dropout1: identity (eval)

    # ---- conv2: stage padded activations in VMEM, one im2col matmul ---------
    h1pad_ref[:, pad:] = out1.astype(cdt)
    hcol = jnp.concatenate(
        [h1pad_ref[:, k * d: k * d + L] for k in range(K)], axis=0)    # (K*Cout, L)
    y2 = jnp.dot(w2_ref[...], hcol, preferred_element_type=jnp.float32)
    out2 = jnp.maximum(y2 + b2_ref[...], 0.0)                          # (Cout, L)
    # dropout2: identity (eval)

    # ---- residual add + final ReLU; lane-dense NCL store --------------------
    o_ref[0] = jnp.maximum(out2 + res, 0.0).astype(o_ref.dtype)


def temporal_block(x_ncl, w1, b1, w2, b2, wd, bd, *, dilation,
                   compute_dtype=jnp.bfloat16):
    """TemporalBlock forward.

    x_ncl : (N, Cin, L) f32, PyTorch NCL layout (fed to the kernel as-is).
    w1    : (Cout, Cin, K)  PyTorch conv1 weight (effective weight == v at init)
    b1    : (Cout,)
    w2    : (Cout, Cout, K) conv2 weight
    b2    : (Cout,)
    wd    : (Cout, Cin)     1x1 downsample weight (n_inputs != n_outputs)
    bd    : (Cout,)
    Returns (N, Cout, L) f32 (NCL), no post-kernel transpose needed.
    """
    N, Cin, L = x_ncl.shape
    Cout, _, K = w1.shape
    pad = (K - 1) * dilation

    # Fused im2col-layout weights (tiny, host/XLA side, done once).
    #   w1_flat[co, k*Cin + ci] = w1[co, ci, k]
    w1_flat = jnp.transpose(w1, (0, 2, 1)).reshape(Cout, K * Cin)
    # Downsample reads the un-shifted slice (tap K-1 block) of the im2col matrix.
    wd_aug = jnp.zeros((Cout, K * Cin), w1.dtype).at[:, (K - 1) * Cin:].set(wd)
    w1_aug = jnp.concatenate([w1_flat, wd_aug], axis=0)                # (2*Cout, K*Cin)
    w2_flat = jnp.transpose(w2, (0, 2, 1)).reshape(Cout, K * Cout)

    # bf16 MXU operands, f32 accumulation & epilogue.
    x_c = x_ncl.astype(compute_dtype)
    w1_aug = w1_aug.astype(compute_dtype)
    w2_flat = w2_flat.astype(compute_dtype)
    b1c = b1.reshape(Cout, 1).astype(jnp.float32)
    b2c = b2.reshape(Cout, 1).astype(jnp.float32)
    bdc = bd.reshape(Cout, 1).astype(jnp.float32)

    kernel = functools.partial(_temporal_block_kernel,
                               dilation=dilation, kernel_size=K)

    out = pl.pallas_call(
        kernel,
        out_shape=jax.ShapeDtypeStruct((N, Cout, L), jnp.float32),
        grid_spec=pltpu.PrefetchScalarGridSpec(
            num_scalar_prefetch=0,
            grid=(N,),
            in_specs=[
                pl.BlockSpec((1, Cin, L), lambda n: (n, 0, 0)),
                pl.BlockSpec((2 * Cout, K * Cin), lambda n: (0, 0)),
                pl.BlockSpec((Cout, 1), lambda n: (0, 0)),
                pl.BlockSpec((Cout, K * Cout), lambda n: (0, 0)),
                pl.BlockSpec((Cout, 1), lambda n: (0, 0)),
                pl.BlockSpec((Cout, 1), lambda n: (0, 0)),
            ],
            out_specs=pl.BlockSpec((1, Cout, L), lambda n: (n, 0, 0)),
            scratch_shapes=[
                pltpu.VMEM((Cin, L + pad), compute_dtype),
                pltpu.VMEM((Cout, L + pad), compute_dtype),
            ],
        ),
        compiler_params=pltpu.CompilerParams(
            dimension_semantics=("parallel",),
            vmem_limit_bytes=32 * 1024 * 1024,   # explicit, safe on v5e/v6e/v7x
        ),
    )(x_c, w1_aug, b1c, w2_flat, b2c, bdc)

    return out


def temporal_block_reference(x_ncl, w1, b1, w2, b2, wd, bd, *, dilation,
                             compute_dtype=jnp.float32):
    """Pure-JAX reference (same math; matmul operands cast to compute_dtype,
    f32 accumulation), NCL in / NCL out."""
    N, Cin, L = x_ncl.shape
    Cout, _, K = w1.shape
    pad = (K - 1) * dilation
    prec = jax.lax.Precision.HIGHEST

    def causal_conv(inp_ncl, w, b):
        C = w.shape[1]
        inp_p = jnp.pad(inp_ncl.astype(compute_dtype), ((0, 0), (0, 0), (pad, 0)))
        cols = jnp.concatenate(
            [inp_p[:, :, k * dilation: k * dilation + L] for k in range(K)],
            axis=1)                                                    # (N, K*C, L)
        w_flat = jnp.transpose(w, (0, 2, 1)).reshape(Cout, K * C).astype(compute_dtype)
        y = jnp.einsum("od,ndl->nol", w_flat, cols,
                       preferred_element_type=jnp.float32, precision=prec)
        return y + b.reshape(1, Cout, 1)

    out1 = jnp.maximum(causal_conv(x_ncl, w1, b1), 0.0)
    out2 = jnp.maximum(causal_conv(out1, w2, b2), 0.0)
    res = jnp.einsum("oc,ncl->nol", wd.astype(compute_dtype),
                     x_ncl.astype(compute_dtype),
                     preferred_element_type=jnp.float32,
                     precision=prec) + bd.reshape(1, Cout, 1)
    return jnp.maximum(out2 + res, 0.0)


if __name__ == "__main__":
    # Small TCN-block shapes: n_inputs != n_outputs so the 1x1 downsample
    # residual branch is exercised.
    N, Cin, Cout, L = 2, 4, 8, 16
    K, stride, dilation = 3, 1, 2
    padding = (K - 1) * dilation          # chomped back off -> causal, out len L
    assert stride == 1, "kernel assumes stride=1 (standard TCN)"

    key = jax.random.PRNGKey(0)
    k_x, k_w1, k_b1, k_w2, k_b2, k_wd, k_bd = jax.random.split(key, 7)

    x = jax.random.normal(k_x, (N, Cin, L), jnp.float32)

    # weight_norm at init: effective weight == v ~ N(0, 0.01). PyTorch layouts.
    w1 = 0.01 * jax.random.normal(k_w1, (Cout, Cin, K), jnp.float32)
    b1 = 0.05 * jax.random.normal(k_b1, (Cout,), jnp.float32)
    w2 = 0.01 * jax.random.normal(k_w2, (Cout, Cout, K), jnp.float32)
    b2 = 0.05 * jax.random.normal(k_b2, (Cout,), jnp.float32)
    wd = 0.01 * jax.random.normal(k_wd, (Cout, Cin), jnp.float32)
    bd = 0.05 * jax.random.normal(k_bd, (Cout,), jnp.float32)

    y = temporal_block(x, w1, b1, w2, b2, wd, bd, dilation=dilation)
    y = jax.block_until_ready(y)
    assert y.shape == (N, Cout, L)

    # Tight check vs a reference that mirrors the kernel's bf16-in / f32-accum math.
    y_ref_bf16 = temporal_block_reference(x, w1, b1, w2, b2, wd, bd,
                                          dilation=dilation,
                                          compute_dtype=jnp.bfloat16)
    assert jnp.allclose(y, y_ref_bf16, atol=1e-4, rtol=1e-4), \
        "mismatch vs bf16-compute reference"

    # Loose check vs full-f32 module semantics (difference = bf16 operand rounding).
    y_ref_f32 = temporal_block_reference(x, w1, b1, w2, b2, wd, bd,
                                         dilation=dilation,
                                         compute_dtype=jnp.float32)
    assert jnp.allclose(y, y_ref_f32, atol=5e-3, rtol=5e-2), \
        "mismatch vs f32 reference"

    print("KERNEL_OK")
</pallas_src>

<mosaic_0001>
module attributes {stable_mosaic.version = 11 : i64} {
  func.func @_temporal_block_kernel(%arg0: i32, %arg1: memref<1x4x16xbf16, #tpu.memory_space<vmem>>, %arg2: memref<16x12xbf16, #tpu.memory_space<vmem>>, %arg3: memref<8x1xf32, #tpu.memory_space<vmem>>, %arg4: memref<8x24xbf16, #tpu.memory_space<vmem>>, %arg5: memref<8x1xf32, #tpu.memory_space<vmem>>, %arg6: memref<8x1xf32, #tpu.memory_space<vmem>>, %arg7: memref<1x8x16xf32, #tpu.memory_space<vmem>>, %arg8: memref<4x20xbf16, #tpu.memory_space<vmem>>, %arg9: memref<8x20xbf16, #tpu.memory_space<vmem>>) attributes {dimension_semantics = [#tpu.dimension_semantics<parallel>], iteration_bounds = array<i64: 2>, scalar_prefetch = 0 : i64, scratch_operands = 2 : i64, tpu.core_type = #tpu.core_type<tc>, window_params = [{transform_indices = @transform_0, window_bounds = array<i64: 1, 4, 16>}, {pipeline_mode = #tpu.pipeline_mode<synchronous>, transform_indices = @transform_1, window_bounds = array<i64: 16, 12>}, {pipeline_mode = #tpu.pipeline_mode<synchronous>, transform_indices = @transform_2, window_bounds = array<i64: 8, 1>}, {pipeline_mode = #tpu.pipeline_mode<synchronous>, transform_indices = @transform_3, window_bounds = array<i64: 8, 24>}, {pipeline_mode = #tpu.pipeline_mode<synchronous>, transform_indices = @transform_4, window_bounds = array<i64: 8, 1>}, {pipeline_mode = #tpu.pipeline_mode<synchronous>, transform_indices = @transform_5, window_bounds = array<i64: 8, 1>}, {transform_indices = @transform_6, window_bounds = array<i64: 1, 8, 16>}]} {
    %c0_i32 = arith.constant 0 : i32
    %0 = arith.cmpi eq, %arg0, %c0_i32 : i32
    %1 = arith.extui %0 : i1 to i32
    %c0_i32_0 = arith.constant 0 : i32
    %2 = arith.cmpi ne, %1, %c0_i32_0 : i32
    scf.if %2 {
      %cst_34 = arith.constant 0.000000e+00 : bf16
      %41 = vector.broadcast %cst_34 : bf16 to vector<4x4xbf16>
      %c0_35 = arith.constant 0 : index
      %c0_36 = arith.constant 0 : index
      %42 = vector.load %arg8[%c0_35, %c0_36] : memref<4x20xbf16, #tpu.memory_space<vmem>>, vector<4x4xbf16>
      tpu.vector_store %arg8[%c0_35, %c0_36], %41 {strides = array<i32>} : memref<4x20xbf16, #tpu.memory_space<vmem>>, vector<4x4xbf16>,
      %cst_37 = arith.constant 0.000000e+00 : bf16
      %43 = vector.broadcast %cst_37 : bf16 to vector<8x4xbf16>
      %c0_38 = arith.constant 0 : index
      %c0_39 = arith.constant 0 : index
      %44 = vector.load %arg9[%c0_38, %c0_39] : memref<8x20xbf16, #tpu.memory_space<vmem>>, vector<8x4xbf16>
      tpu.vector_store %arg9[%c0_38, %c0_39], %43 {strides = array<i32>} : memref<8x20xbf16, #tpu.memory_space<vmem>>, vector<8x4xbf16>,
    } else {
    }
    %c0 = arith.constant 0 : index
    %c0_1 = arith.constant 0 : index
    %c0_2 = arith.constant 0 : index
    %3 = vector.load %arg1[%c0, %c0_1, %c0_2] : memref<1x4x16xbf16, #tpu.memory_space<vmem>>, vector<1x4x16xbf16>
    %4 = vector.shape_cast %3 : vector<1x4x16xbf16> to vector<4x16xbf16>
    %c0_3 = arith.constant 0 : index
    %c4 = arith.constant 4 : index
    %5 = vector.load %arg8[%c0_3, %c4] : memref<4x20xbf16, #tpu.memory_space<vmem>>, vector<4x16xbf16>
    tpu.vector_store %arg8[%c0_3, %c4], %4 {strides = array<i32>} : memref<4x20xbf16, #tpu.memory_space<vmem>>, vector<4x16xbf16>,
    %c0_4 = arith.constant 0 : index
    %c0_5 = arith.constant 0 : index
    %6 = vector.load %arg8[%c0_4, %c0_5] : memref<4x20xbf16, #tpu.memory_space<vmem>>, vector<4x16xbf16>
    %c0_6 = arith.constant 0 : index
    %c2 = arith.constant 2 : index
    %7 = vector.load %arg8[%c0_6, %c2] : memref<4x20xbf16, #tpu.memory_space<vmem>>, vector<4x16xbf16>
    %c0_7 = arith.constant 0 : index
    %c4_8 = arith.constant 4 : index
    %8 = vector.load %arg8[%c0_7, %c4_8] : memref<4x20xbf16, #tpu.memory_space<vmem>>, vector<4x16xbf16>
    %9 = tpu.concatenate %6, %7, %8 in 0 : vector<4x16xbf16>, vector<4x16xbf16>, vector<4x16xbf16> -> vector<12x16xbf16>
    %c0_9 = arith.constant 0 : index
    %c0_10 = arith.constant 0 : index
    %10 = vector.load %arg2[%c0_9, %c0_10] : memref<16x12xbf16, #tpu.memory_space<vmem>>, vector<16x12xbf16>
    %cst = arith.constant dense<0.000000e+00> : vector<16x16xf32>
    %11 = tpu.matmul %10, %9, %cst {dimension_numbers = #tpu.dot_dimension_numbers<[1], [0], [0], [1], [0, 0, 1, 1], [], []>} : vector<16x12xbf16>, vector<12x16xbf16>, vector<16x16xf32> -> vector<16x16xf32>
    %12 = vector.extract_strided_slice %11 {offsets = [0, 0], sizes = [8, 16], strides = [1, 1]} : vector<16x16xf32> to vector<8x16xf32>
    %c0_11 = arith.constant 0 : index
    %c0_12 = arith.constant 0 : index
    %13 = vector.load %arg3[%c0_11, %c0_12] : memref<8x1xf32, #tpu.memory_space<vmem>>, vector<8x1xf32>
    %14 = vector.broadcast %13 : vector<8x1xf32> to vector<8x16xf32>
    %15 = arith.addf %12, %14 : vector<8x16xf32>
    %cst_13 = arith.constant 0.000000e+00 : f32
    %16 = vector.broadcast %cst_13 : f32 to vector<8x16xf32>
    %17 = arith.maximumf %15, %16 : vector<8x16xf32>
    %18 = vector.extract_strided_slice %11 {offsets = [8, 0], sizes = [8, 16], strides = [1, 1]} : vector<16x16xf32> to vector<8x16xf32>
    %c0_14 = arith.constant 0 : index
    %c0_15 = arith.constant 0 : index
    %19 = vector.load %arg6[%c0_14, %c0_15] : memref<8x1xf32, #tpu.memory_space<vmem>>, vector<8x1xf32>
    %20 = vector.broadcast %19 : vector<8x1xf32> to vector<8x16xf32>
    %21 = arith.addf %18, %20 : vector<8x16xf32>
    %22 = arith.truncf %17 : vector<8x16xf32> to vector<8x16xbf16>
    %c0_16 = arith.constant 0 : index
    %c4_17 = arith.constant 4 : index
    %23 = vector.load %arg9[%c0_16, %c4_17] : memref<8x20xbf16, #tpu.memory_space<vmem>>, vector<8x16xbf16>
    tpu.vector_store %arg9[%c0_16, %c4_17], %22 {strides = array<i32>} : memref<8x20xbf16, #tpu.memory_space<vmem>>, vector<8x16xbf16>,
    %c0_18 = arith.constant 0 : index
    %c0_19 = arith.constant 0 : index
    %24 = vector.load %arg9[%c0_18, %c0_19] : memref<8x20xbf16, #tpu.memory_space<vmem>>, vector<8x16xbf16>
    %c0_20 = arith.constant 0 : index
    %c2_21 = arith.constant 2 : index
    %25 = vector.load %arg9[%c0_20, %c2_21] : memref<8x20xbf16, #tpu.memory_space<vmem>>, vector<8x16xbf16>
    %c0_22 = arith.constant 0 : index
    %c4_23 = arith.constant 4 : index
    %26 = vector.load %arg9[%c0_22, %c4_23] : memref<8x20xbf16, #tpu.memory_space<vmem>>, vector<8x16xbf16>
    %27 = tpu.concatenate %24, %25, %26 in 0 : vector<8x16xbf16>, vector<8x16xbf16>, vector<8x16xbf16> -> vector<24x16xbf16>
    %c0_24 = arith.constant 0 : index
    %c0_25 = arith.constant 0 : index
    %28 = vector.load %arg4[%c0_24, %c0_25] : memref<8x24xbf16, #tpu.memory_space<vmem>>, vector<8x24xbf16>
    %cst_26 = arith.constant dense<0.000000e+00> : vector<8x16xf32>
    %29 = tpu.matmul %28, %27, %cst_26 {dimension_numbers = #tpu.dot_dimension_numbers<[1], [0], [0], [1], [0, 0, 1, 1], [], []>} : vector<8x24xbf16>, vector<24x16xbf16>, vector<8x16xf32> -> vector<8x16xf32>
    %c0_27 = arith.constant 0 : index
    %c0_28 = arith.constant 0 : index
    %30 = vector.load %arg5[%c0_27, %c0_28] : memref<8x1xf32, #tpu.memory_space<vmem>>, vector<8x1xf32>
    %31 = vector.broadcast %30 : vector<8x1xf32> to vector<8x16xf32>
    %32 = arith.addf %29, %31 : vector<8x16xf32>
    %cst_29 = arith.constant 0.000000e+00 : f32
    %33 = vector.broadcast %cst_29 : f32 to vector<8x16xf32>
    %34 = arith.maximumf %32, %33 : vector<8x16xf32>
    %35 = arith.addf %34, %21 : vector<8x16xf32>
    %cst_30 = arith.constant 0.000000e+00 : f32
    %36 = vector.broadcast %cst_30 : f32 to vector<8x16xf32>
    %37 = arith.maximumf %35, %36 : vector<8x16xf32>
    %c0_31 = arith.constant 0 : index
    %c0_32 = arith.constant 0 : index
    %c0_33 = arith.constant 0 : index
    %38 = vector.load %arg7[%c0_31, %c0_32, %c0_33] : memref<1x8x16xf32, #tpu.memory_space<vmem>>, vector<1x8x16xf32>
    %39 = vector.shape_cast %38 : vector<1x8x16xf32> to vector<8x16xf32>
    %40 = vector.shape_cast %37 : vector<8x16xf32> to vector<1x8x16xf32>
    tpu.vector_store %arg7[%c0_31, %c0_32, %c0_33], %40 {strides = array<i32>} : memref<1x8x16xf32, #tpu.memory_space<vmem>>, vector<1x8x16xf32>,
    return
  }
  func.func @transform_0(%arg0: i32) -> (i32, i32, i32) {
    %c0_i32 = arith.constant 0 : i32
    %c0_i32_0 = arith.constant 0 : i32
    %c0_i32_1 = arith.constant 0 : i32
    return %arg0, %c0_i32, %c0_i32_0 : i32, i32, i32
  }
  func.func @transform_1(%arg0: i32) -> (i32, i32) {
    %c0_i32 = arith.constant 0 : i32
    %c0_i32_0 = arith.constant 0 : i32
    %c0_i32_1 = arith.constant 0 : i32
    return %c0_i32, %c0_i32_0 : i32, i32
  }
  func.func @transform_2(%arg0: i32) -> (i32, i32) {
    %c0_i32 = arith.constant 0 : i32
    %c0_i32_0 = arith.constant 0 : i32
    %c0_i32_1 = arith.constant 0 : i32
    return %c0_i32, %c0_i32_0 : i32, i32
  }
  func.func @transform_3(%arg0: i32) -> (i32, i32) {
    %c0_i32 = arith.constant 0 : i32
    %c0_i32_0 = arith.constant 0 : i32
    %c0_i32_1 = arith.constant 0 : i32
    return %c0_i32, %c0_i32_0 : i32, i32
  }
  func.func @transform_4(%arg0: i32) -> (i32, i32) {
    %c0_i32 = arith.constant 0 : i32
    %c0_i32_0 = arith.constant 0 : i32
    %c0_i32_1 = arith.constant 0 : i32
    return %c0_i32, %c0_i32_0 : i32, i32
  }
  func.func @transform_5(%arg0: i32) -> (i32, i32) {
    %c0_i32 = arith.constant 0 : i32
    %c0_i32_0 = arith.constant 0 : i32
    %c0_i32_1 = arith.constant 0 : i32
    return %c0_i32, %c0_i32_0 : i32, i32
  }
  func.func @transform_6(%arg0: i32) -> (i32, i32, i32) {
    %c0_i32 = arith.constant 0 : i32
    %c0_i32_0 = arith.constant 0 : i32
    %c0_i32_1 = arith.constant 0 : i32
    return %arg0, %c0_i32, %c0_i32_0 : i32, i32, i32
  }
}

</mosaic_0001>

<bundles_post_ra>
// kernel: tpu_custom_call.1
= control target key start
LH: loop header
LB: loop body
LE: loop exit
PB: predicated region body
PF: predicated region fallthrough
CT: control target
= control target key end

     0   :  { %11 = vsyncpa [#allocation5], 0  ;;  %s847_s0 = inlined_call_operand.vmem [shape: bf16[2,4,16], index: 0, kind: input, shape index: {}]   ;;  %s848_s1 = inlined_call_operand.vmem [shape: bf16[16,12], index: 1, kind: input, shape index: {}]   ;;  %s849_s2 = inlined_call_operand.vmem [shape: f32[8,1], index: 2, kind: input, shape index: {}]   ;;  %s850_s3 = inlined_call_operand.vmem [shape: bf16[8,24], index: 3, kind: input, shape index: {}]   ;;  %s851_s4 = inlined_call_operand.vmem [shape: f32[8,1], index: 4, kind: input, shape index: {}]   ;;  %s852_s5 = inlined_call_operand.vmem [shape: f32[8,1], index: 5, kind: input, shape index: {}]   ;;  %s853_s6 = inlined_call_operand.hbm [shape: f32[2,8,16], index: 6, kind: output, shape index: {}]  }
   0x1   :  { %13 = vsyncpa [#allocation5 + $0x1], 0  ;;  %s711_s21 = smov 0   ;;  %s713_s22 = smov 0  }
   0x2   :  { %s715_s23 = smov 0   ;;  %s717_s24 = smov 0  }
   0x3 LB: > { %s732_s25 = sadd.s32 4294967295, %s665_s24   ;;  %s515_s26 = sadd.s32 4294967294, %s665_s24   ;;  %s665_s24 = sphi %s717_s24, %s859_s24   ;;  %s661_s23 = sphi %s715_s23, %s858_s23   ;;  %s657_s22 = sphi %s713_s22, %s857_s22   ;;  %s653_s21 = sphi %s711_s21, %s856_s21  }
   0x4   : > { %s736_s27 = sadd.s32 1, %s665_s24   ;;  %s157_s28 = sadd.s32 1, %s661_s23 }
   0x5   : > { %s154_s29 = ssub.s32 %s665_s24, %s736_s27  ;;  %p167_p0 = scmp.ne.s32.totalorder %s661_s23, %s657_s22 }
   0x6   : > { %p155_p1 = scmp.eq.s32.totalorder %s154_s29, 0  ;;  %p168_p2 = scmp.eq.s32.totalorder %s732_s25, 1 }
   0x7   : > { %p173_p3 = scmp.ne.s32.totalorder %s657_s22, %s653_s21  ;;  %p174_p4 = scmp.eq.s32.totalorder %s515_s26, 1 }
   0x8   : > { %s747_s30 = scalar_select %p155_p1, %s661_s23, %s157_s28  }
   0x9   : > { %p749_p5 = por %p168_p2, %p167_p0  ;;  %p753_p6 = por %p174_p4, %p173_p3 }
   0xa   : > { %p518_p7 = scmp.ge.s32.totalorder %s665_s24, 1  ;;  %p214_p8 = scmp.lt.s32.totalorder %s665_s24, 3 }
   0xc   : > { %p215_p9 = pnand %p518_p7, %p214_p8 }
   0xd   : > { %s240_s9 = sand.u32 (!%p215_p9), 1, %s657_s22   ;;  %p243_p10 = scmp.lt.s32.totalorder (!%p215_p9), %s732_s25, 1 }
   0xe   : > { %218 = sbr.rel (%p215_p9) target bundleno = 978 (0x3d2), region = 44  ;;  %s763_s10 = sshll.u32 (!%p215_p9), %s240_s9, 3 }
   0xf   : > { %s242_s16 = scalar_lea.vmem (!%p215_p9), [#allocation4], %s763_s10  ;;  %p521_p11 = scmp.ne.s32.totalorder (!%p215_p9), %s732_s25, 0 }
  0x15   : > { %s244_s11 = scalar_select %p243_p10, %s732_s25, 1 }
  0x16   : > { %251 = sbr.rel (%p521_p11) target bundleno = 29 (0x1d), region = 48  ;;  %vm252_vm0 = vcmask (!%p521_p11), 25600   ;;  %vm254_vm1 = vcmask (!%p521_p11), 27648   ;;  %v667_v0 = vmov (!%p521_p11), 0  }
  0x17   : > { %s520_s12 = sshll.u32 %s244_s11, 1  ;;  %253 = vst.msk [vmem:[#allocation2] sm:$0x3] (!%p521_p11), %vm252_vm0, %v667_v0 }
  0x18   : > { %s246_s15 = scalar_lea.vmem %s847_s0, %s520_s12  ;;  %255 = vst.msk [vmem:[#allocation3] sm:$0xf] (!%p521_p11), %vm254_vm1, %v667_v0 }
  0x1d PF: > { %v256_v1 = vld [vmem:[%s246_s15] sm:$0x3]  ;;  %s668_s17 = smov 4   ;;  %v669_v2 = vmov 1983009808   ;;  %v269_v4 = vlaneseq  ;;  %vm261_vm2 = vcmask 156704  }
  0x1e   : > { %258 = vrot.lane.b32.xlu0 %v256_v1, %s668_s17  ;;  %v267_v3 = vunpack.c.l.s4 %v669_v2  ;;  %v670_v8 = vmov 0.0   ;;  %vm671_vm3 = vmmov 0   ;;  %v672_v10 = vmov 0   ;;  %s673_s18 = smov 124   ;;  %s674_s19 = smov 126   ;;  %v347_v16 = vld [vmem:[%s849_s2] sm:$0xff] }
  0x1f   : > { %v270_v7 = vshrl.u32 %v269_v4, 7  ;;  %537 = vmatprep.subr.bf16.mxu0 %v670_v8  ;;  %543 = vmatprep.subr.bf16.mxu1 %v670_v8  ;;  %vm285_vm4 = vcmask 1041408   ;;  %vm289_vm5 = vcmask 1043456   ;;  %vm303_vm6 = vcmask 1045504   ;;  %v601_v22 = vld [vmem:[%s848_s1] sm:$0xff]   ;;  %s443_s29 = scalar_lea.sflag [#allocation5], %s240_s9 }
  0x20   : > { %v268_v6 = vunpack.c.0.s8 %v267_v3  ;;  %539 = vmatprep.mubr.msk.bf16.mxu0 %vm671_vm3, %v670_v8  ;;  %547 = vmatprep.mubr.msk.bf16.mxu1 %vm671_vm3, %v670_v8  ;;  %vm299_vm7 = vcmask 97280   ;;  %vm369_vm8 = vcmask 158752   ;;  %v355_v34 = vld [vmem:[%s852_s5] sm:$0xff]  ;;  %vm390_vm9 = vcmask 195584   ;;  %s675_s11 = smov [#allocation4]  }
  0x21   : > { %598 = vset.pattern.permute.xlu1 %v672_v10  ;;  %599 = vset.pattern.permute.xlu0 %v672_v10  ;;  %v384_v35 = vld [vmem:[%s851_s4] sm:$0xff]  ;;  %vm440_vm10 = vcmask 130048   ;;  %s607_s12 = sshll.u32 %s675_s11, 4  ;;  %s608_s12 = int_to_ptr.vmem [resolvable:$false] %s607_s12 }
  0x22   : > { %v271_v9 = vsub.s32 %v268_v6, %v270_v7  ;;  %v383_v40 = vld [vmem:[%s850_s3] sm:$0xf]  ;;  %s609_s13 = scalar_lea.vmem %s608_s12, 256 }
  0x90   : > { %v259_v5 = vpop.permute.xlu0 %258 }
  0x91   : > { %262 = vst.msk [vmem:[#allocation2] sm:$0x3] %vm261_vm2, %v259_v5 }
  0x98   : > { %v263_v11 = vld [vmem:[#allocation2] sm:$0x3] }
  0x99   : > { %v279_v12 = vrot.slane %v263_v11, %v271_v9  ;;  %v265_v13 = vcombine.low %v263_v11, %v263_v11 }
  0x9b   : > { %v282_v14 = vcombine.low %v279_v12, %v279_v12  ;;  %v272_v15 = vrot.slane %v265_v13, %v271_v9 }
  0x9d   : > { %283 = vrot.lane.b32.xlu1 %v282_v14, %s673_s18  ;;  %280 = vrot.lane.b32.xlu0 %v272_v15, %s674_s19 }
  0xa1   : > { %350 = vperm.xlu1 %598, %v347_v16  }
 0x10f   : > { %v284_v17 = vpop.permute.xlu1 %283  ;;  %v281_v18 = vpop.permute.xlu0 %280 }
 0x110   : > { %v288_v19 = vsel %vm285_vm4, %v263_v11, %v281_v18 }
 0x111   : > { %v291_v20 = vsel %vm289_vm5, %v288_v19, %v284_v17 }
 0x112   : > { %v304_v21 = vsel %vm303_vm6, %v291_v20, 0 }
 0x113   : > { %538 = vmatpush3.bf16.msra.mxu0 %v304_v21 }
 0x116   : > { %540 = vmatmul.mubr.msk.bf16.vlgmr.msra.gmra.mrb[0].mxu0 %vm299_vm7, %v601_v22 }
 0x120   : > { %v351_v23 = vpop.permute.xlu1 %350 }
 0x1e9   : > { %v340_v24 = vpop.f32.mrb[0].mxu0 }
 0x1ea   : > { %v353_v25 = vadd.f32 %v351_v23, %v340_v24  ;;  %v541_v26 = vpop.f32.mrb[1].mxu0 }
 0x1eb   : > { %v343_v27 = vpop.f32.mrb[2].mxu0 }
 0x1ec   : > { %v354_v28 = vmax.f32 %v353_v25, 0.0  ;;  %v542_v29 = vpop.f32.mrb[3].mxu0 }
 0x1ee   : > { %v531_v30 = vpack.c.bf16 %v354_v28, %v354_v28 }
 0x1f0   : > { %366 = vrot.lane.b32.xlu0 %v531_v30, %s668_s17 }
 0x262   : > { %v367_v31 = vpop.permute.xlu0 %366 }
 0x263   : > { %370 = vst.msk [vmem:[#allocation3] sm:$0xf] %vm369_vm8, %v367_v31 }
 0x26a   : > { %v371_v32 = vld [vmem:[#allocation3] sm:$0xf] }
 0x26b   : > { %v525_v33 = vcombine.low %v371_v32, %v371_v32 }
 0x26d   : > { %377 = vrot.lane.b32.xlu0 %v525_v33, %s673_s18  ;;  %375 = vrot.lane.b32.xlu1 %v525_v33, %s674_s19  ;;  %s528_s18 = sshll.u32 %s732_s25, 7  ;;  %s456_s19 = sshll.u32 %s242_s16, 4  ;;  %s803_s19 = int_to_ptr.vmem [resolvable:$true] %s456_s19 }
 0x26e   : > { %s801_s28 = scalar_lea.hbm %s853_s6, %s528_s18  ;;  %s603_s25 = scalar_lea.vmem %s803_s19, 128 }
 0x26f   : > { %p604_p12 = scmp.ne.s32.totalorder %s803_s19, %s603_s25  ;;  %p610_p1 = scmp.lt.s32.totalorder %s803_s19, %s608_s12 }
 0x270   : > { %p611_p2 = scmp.lt.s32.totalorder %s609_s13, %s603_s25 }
 0x271   : > { %358 = vperm.xlu0 %599, %v355_v34   ;;  %387 = vperm.xlu1 %598, %v384_v35   ;;  %p605_p13 = pnand %p604_p12, %p749_p5 }
 0x272   : > { %p612_p3 = por %p611_p2, %p610_p1 }
 0x273   : > { %p606_p0 = pneg %p605_p13 }
 0x275   : > { %p613_p4 = pnand %p612_p3, %p606_p0 }
 0x2df   : > { %v376_v36 = vpop.permute.xlu1 %375  ;;  %v378_v38 = vpop.permute.xlu0 %377 }
 0x2e0   : > { %v381_v37 = vsel %vm289_vm5, %v371_v32, %v376_v36  ;;  %v395_v39 = vsel %vm289_vm5, %v378_v38, 0 }
 0x2e1   : > { %544 = vmatpush3.bf16.msra.mxu1 %v381_v37 }
 0x2e2   : > { %545 = vmatprep.subr.bf16.mxu1 %v670_v8 }
 0x2e5   : > { %546 = vmatpush3.bf16.msra.mxu1 %v395_v39 }
 0x2e8   : > { %548 = vmatmul.mubr.msk.bf16.vlgmr.msra.gmra.mrb[0].mxu1 %vm390_vm9, %v383_v40 }
 0x2f0   : > { %v359_v41 = vpop.permute.xlu0 %358  ;;  %v388_v42 = vpop.permute.xlu1 %387 }
 0x2f1   : > { %v361_v47 = vadd.f32 %v359_v41, %v343_v27 }
 0x3bb   : > { %v431_v43 = vpop.f32.mrb[0].mxu1 }
 0x3bc   : > { %v432_v44 = vadd.f32 %v431_v43, %v388_v42  ;;  %v549_v45 = vpop.f32.mrb[1].mxu1 }
 0x3bd   : > { %v434_v46 = vpop.f32.mrb[2].mxu1 }
 0x3be   : > { %v437_v48 = vmax.f32 %v432_v44, 0.0  ;;  %v550_v49 = vpop.f32.mrb[3].mxu1 }
 0x3c0   : > { %v438_v50 = vadd.f32 %v437_v48, %v361_v47 }
 0x3c2   : > { %v439_v51 = vmax.f32 %v438_v50, 0.0 }
 0x3c4   : > { %441 = vst.msk [vmem:[%s242_s16] sm:$0xff] %vm440_vm10, %v439_v51 }
 0x3c5   : > { %616 = shalt.err (!%p613_p4)
}
 0x3c6   : > { %s617_s9 = scalar_lea.hbm %s801_s28, 128  ;;  %s621_s14 = scalar_lea.hbm %s853_s6, 256 }
 0x3c7   : > { %p618_p7 = scmp.ne.s32.totalorder %s801_s28, %s617_s9  ;;  %p622_p10 = scmp.lt.u32.totalorder %s801_s28, %s853_s6 }
 0x3c8   : > { %p623_p11 = scmp.lt.u32.totalorder %s621_s14, %s617_s9  ;;  %p625_p13 = scmp.lt.u32.totalorder %s617_s9, %s801_s28 }
 0x3c9   : > { %p619_p8 = pnand %p618_p7, %p749_p5 }
 0x3ca   : > { %p624_p12 = por %p623_p11, %p622_p10 }
 0x3cb   : > { %p620_p9 = pneg %p619_p8 }
 0x3cc   : > { %p626_p0 = por %p625_p13, %p624_p12 }
 0x3ce   : > { %p627_p1 = pnand %p626_p0, %p620_p9 }
 0x3d0   : > { %630 = shalt.err (!%p627_p1)
}
 0x3d1   : > { %551 = dma.vmem_to_hbm [thread:$0]  (%p749_p5), %s803_s19, 128, %s801_s28, %s443_s29  }
 0x3d2 PF: > { %p557_p2 = scmp.ge.s32.totalorder %s665_s24, 2  ;;  %s468_s18 = sand.u32 1, %s653_s21  }
 0x3d3   : > { %s469_s20 = scalar_lea.sflag [#allocation5], %s468_s18 }
 0x3d4   : > { %p554_p3 = pnand %p557_p2, %p753_p6 }
 0x3d6   : > { %648 = dma.done.wait (!%p554_p3), %s469_s20, 128  }
 0x3d7   : > { %650 = vsyncadd (!%p554_p3), %s469_s20, 4294967168  ;;  %p16_p4 = scmp.ge.s32.totalorder %s736_s27, 4   ;;  %s856_s21 = smov %s657_s22 }
 0x3d8   : > { %s857_s22 = smov %s661_s23  ;;  %s858_s23 = smov %s747_s30 }
 0x3d9   : > { %s859_s24 = smov %s736_s27  ;;  %18 = sbr.rel (!%p16_p4) target bundleno = 3 (0x3), region = 83 }
 0x3e0   :  { %474 = vsyncpa [#allocation5], 1 }
 0x3e1   :  { %476 = vsyncpa [#allocation5 + $0x1], 1 }

</bundles_post_ra>
